<compile_context>
chip_gen: v7x
topology: tpu7x:2x2x1
jax: 0.10.0
libtpu: 0.0.40
codegen_flags: <defaults>
</compile_context>

<pallas_src>
import numpy as np
import jax
import jax.numpy as jnp
from jax.experimental import pallas as pl
from jax.experimental.pallas import tpu as pltpu

_SQRT_2_OVER_PI = 0.7978845608028654  # math.sqrt(2 / math.pi)


# ---------------------------------------------------------------------------
# Kernel: elementwise tanh-GELU on one (block_rows, cols) lane-dense tile.
# ---------------------------------------------------------------------------
def _gelu_kernel(x_ref, o_ref):
    # Upcast to f32 for the math (v5e's VPU/EUP have no bf16 datapath); store in
    # the native I/O dtype so HBM traffic stays at the input's byte width.
    x = x_ref[...].astype(jnp.float32)
    inner = _SQRT_2_OVER_PI * (x + 0.044715 * (x * x * x))
    cdf = 0.5 * (1.0 + jnp.tanh(inner))          # tanh -> EUP slot (otherwise idle)
    o_ref[...] = (x * cdf).astype(o_ref.dtype)


# ---------------------------------------------------------------------------
# Helpers
# ---------------------------------------------------------------------------
def _round_up(a, b):
    return -(-a // b) * b


def _sublane(dtype):
    # Sublane packing: 8 rows for 4-byte, 16 for 2-byte, 32 for 1-byte dtypes.
    return max(8, 32 // jnp.dtype(dtype).itemsize)


def _block_budget_bytes():
    """Per-buffer block budget, sized per TPU generation."""
    try:
        kind = jax.devices()[0].device_kind.lower()
    except Exception:
        kind = ""
    if "v5" in kind:      # 16 MiB scoped-VMEM default -> keep blocks modest
        return 2 << 20
    if "v7" in kind:      # 3.2 TB/s HBM -> bigger blocks amortize per-step overhead
        return 8 << 20
    return 4 << 20        # v6e / default


# ---------------------------------------------------------------------------
# Wrapper: lane-dense (rows, cols) view -> tiled pallas_call (no extra HBM passes).
# ---------------------------------------------------------------------------
def gelu_pallas(x):
    orig_shape = x.shape
    dtype = x.dtype
    n = int(np.prod(orig_shape)) if len(orig_shape) else 1
    if n == 0:
        return x

    itemsize = jnp.dtype(dtype).itemsize
    sub = _sublane(dtype)

    # Build a lane-dense (rows, cols) view with cols a multiple of 128, avoiding
    # whole-array pads whenever possible.
    pad = 0
    if len(orig_shape) >= 2 and orig_shape[-1] % 128 == 0:
        # Typical activation layout: collapse leading dims, keep the last dim.
        cols = orig_shape[-1]
        rows = n // cols
        x2 = x.reshape(rows, cols)
    else:
        cols = None
        for c in (1024, 512, 256, 128):
            if n % c == 0:
                cols = c
                break
        xf = x.reshape(-1)
        if cols is None:
            cols = 128
            pad = _round_up(n, cols) - n       # tail-only pad, <= 127 elements
            xf = jnp.pad(xf, (0, pad))
        rows = (n + pad) // cols
        x2 = xf.reshape(rows, cols)

    # Row tiling: per-generation budget, sublane-aligned, grid >= 2 when there is
    # enough work so the "parallel" axis actually shards across two TensorCores.
    budget_rows = max(sub, (_block_budget_bytes() // (cols * itemsize)) // sub * sub)
    if rows <= budget_rows:
        if rows >= 4 * sub:
            block_rows = _round_up(-(-rows // 2), sub)   # split across 2 cores
        else:
            block_rows = rows        # single block == full array dims (legal shape)
    else:
        block_rows = budget_rows
    grid_len = -(-rows // block_rows)

    block_bytes = block_rows * cols * itemsize
    # in + out, double-buffered = 4 live slabs; leave headroom, cap under v7x's 64 MiB.
    vmem_limit = int(min(max(4 * block_bytes + (8 << 20), 16 << 20), 48 << 20))

    out2 = pl.pallas_call(
        _gelu_kernel,
        grid=(grid_len,),
        in_specs=[pl.BlockSpec((block_rows, cols), lambda i: (i, 0))],
        out_specs=pl.BlockSpec((block_rows, cols), lambda i: (i, 0)),
        out_shape=jax.ShapeDtypeStruct((rows, cols), dtype),
        compiler_params=pltpu.CompilerParams(
            dimension_semantics=("parallel",),
            vmem_limit_bytes=vmem_limit),
    )(x2)

    if pad:
        return out2.reshape(-1)[:n].reshape(orig_shape)
    return out2.reshape(orig_shape)


# ---------------------------------------------------------------------------
if __name__ == "__main__":
    key = jax.random.PRNGKey(0)
    x = jax.random.normal(key, (2, 4, 16, 16), dtype=jnp.float32) * 3.0

    out = jax.block_until_ready(gelu_pallas(x))

    # Reference (same tanh-approx formula as the PyTorch module).
    inner = _SQRT_2_OVER_PI * (x + 0.044715 * (x ** 3))
    ref = x * 0.5 * (1.0 + jnp.tanh(inner))

    assert out.shape == x.shape
    assert out.dtype == x.dtype
    assert bool(jnp.all(jnp.isfinite(out)))
    np.testing.assert_allclose(np.asarray(out), np.asarray(ref),
                               rtol=1e-5, atol=1e-5)
    print("KERNEL_OK")
</pallas_src>

<mosaic_0001>
module attributes {stable_mosaic.version = 11 : i64} {
  func.func @_gelu_kernel(%arg0: i32, %arg1: memref<2x1024xf32, #tpu.memory_space<vmem>>, %arg2: memref<2x1024xf32, #tpu.memory_space<vmem>>) attributes {dimension_semantics = [#tpu.dimension_semantics<parallel>], iteration_bounds = array<i64: 1>, scalar_prefetch = 0 : i64, scratch_operands = 0 : i64, tpu.core_type = #tpu.core_type<tc>, window_params = [{transform_indices = @transform_0, window_bounds = array<i64: 2, 1024>}, {transform_indices = @transform_1, window_bounds = array<i64: 2, 1024>}]} {
    %c0 = arith.constant 0 : index
    %c0_0 = arith.constant 0 : index
    %0 = vector.load %arg1[%c0, %c0_0] : memref<2x1024xf32, #tpu.memory_space<vmem>>, vector<2x1024xf32>
    %1 = arith.mulf %0, %0 : vector<2x1024xf32>
    %2 = arith.mulf %1, %0 : vector<2x1024xf32>
    %cst = arith.constant 4.471500e-02 : f32
    %3 = vector.broadcast %cst : f32 to vector<2x1024xf32>
    %4 = arith.mulf %3, %2 : vector<2x1024xf32>
    %5 = arith.addf %0, %4 : vector<2x1024xf32>
    %cst_1 = arith.constant 0.797884583 : f32
    %6 = vector.broadcast %cst_1 : f32 to vector<2x1024xf32>
    %7 = arith.mulf %6, %5 : vector<2x1024xf32>
    %8 = math.tanh %7 : vector<2x1024xf32>
    %cst_2 = arith.constant 1.000000e+00 : f32
    %9 = vector.broadcast %cst_2 : f32 to vector<2x1024xf32>
    %10 = arith.addf %9, %8 : vector<2x1024xf32>
    %cst_3 = arith.constant 5.000000e-01 : f32
    %11 = vector.broadcast %cst_3 : f32 to vector<2x1024xf32>
    %12 = arith.mulf %11, %10 : vector<2x1024xf32>
    %13 = arith.mulf %0, %12 : vector<2x1024xf32>
    %c0_4 = arith.constant 0 : index
    %c0_5 = arith.constant 0 : index
    %14 = vector.load %arg2[%c0_4, %c0_5] : memref<2x1024xf32, #tpu.memory_space<vmem>>, vector<2x1024xf32>
    tpu.vector_store %arg2[%c0_4, %c0_5], %13 {strides = array<i32>} : memref<2x1024xf32, #tpu.memory_space<vmem>>, vector<2x1024xf32>,
    return
  }
  func.func @transform_0(%arg0: i32) -> (i32, i32) {
    %c0_i32 = arith.constant 0 : i32
    %c0_i32_0 = arith.constant 0 : i32
    return %arg0, %c0_i32 : i32, i32
  }
  func.func @transform_1(%arg0: i32) -> (i32, i32) {
    %c0_i32 = arith.constant 0 : i32
    %c0_i32_0 = arith.constant 0 : i32
    return %arg0, %c0_i32 : i32, i32
  }
}

</mosaic_0001>

<bundles_post_ra>
// kernel: tpu_custom_call.1
= control target key start
LH: loop header
LB: loop body
LE: loop exit
PB: predicated region body
PF: predicated region fallthrough
CT: control target
= control target key end

     0   :  { %6 = vsyncpa [#allocation3], 0  ;;  %s148_s0 = inlined_call_operand.hbm [shape: f32[2,1024], index: 0, kind: input, shape index: {}]   ;;  %s149_s1 = inlined_call_operand.hbm [shape: f32[2,1024], index: 1, kind: output, shape index: {}]  }
   0x1   :  { %7 = vsyncpa [#allocation4], 0  ;;  %s112_s6 = smov [#allocation2]   ;;  %s64_s10 = scalar_lea.hbm %s148_s0, 256 }
   0x2   :  { %s14_s7 = sshll.u32 %s112_s6, 4  ;;  %p65_p0 = scmp.ne.s32.totalorder %s148_s0, %s64_s10  ;;  %s15_s7 = int_to_ptr.vmem [resolvable:$true] %s14_s7 }
   0x3   :  { %p68_p1 = scmp.lt.u32.totalorder %s64_s10, %s148_s0 }
   0x5   :  { %p70_p2 = pnand %p68_p1, %p65_p0 }
   0x7   :  { %73 = shalt.err (!%p70_p2)
}
   0x8   :  { %s74_s15 = scalar_lea.vmem %s15_s7, 256  ;;  %p79_p4 = scmp.lt.s32.totalorder %s15_s7, %s15_s7 }
   0x9   :  { %p75_p3 = scmp.ne.s32.totalorder %s15_s7, %s74_s15  ;;  %p80_p5 = scmp.lt.s32.totalorder %s74_s15, %s74_s15 }
   0xb   :  { %p81_p6 = por %p80_p5, %p79_p4 }
   0xd   :  { %p82_p7 = pnand %p81_p6, %p75_p3 }
   0xf   :  { %85 = shalt.err (!%p82_p7)
}
  0x10   :  { %17 = dma.hbm_to_vmem [thread:$0]  %s148_s0, 256, %s15_s7, [#allocation3]  }
  0x11   :  { %108 = dma.done.wait [#allocation3], 256  }
  0x12   :  { %109 = vsyncadd [#allocation3], 4294967040  ;;  %v21_v0 = vld [vmem:[#allocation2] sm:$0xff]  ;;  %v22_v1 = vld [vmem:[#allocation2 + $0x8] sm:$0xff]  ;;  %s113_s0 = smov [#allocation5]  }
  0x13   :  { %v23_v2 = vmul.f32 %v21_v0, %v21_v0  ;;  %v24_v3 = vmul.f32 %v22_v1, %v22_v1  ;;  %s49_s18 = sshll.u32 %s113_s0, 4  ;;  %s50_s18 = int_to_ptr.vmem [resolvable:$true] %s49_s18 }
  0x14   :  { %s86_s19 = scalar_lea.vmem %s50_s18, 256  ;;  %p91_p9 = scmp.lt.s32.totalorder %s50_s18, %s50_s18 }
  0x15   :  { %v25_v4 = vmul.f32 %v23_v2, %v21_v0  ;;  %v26_v5 = vmul.f32 %v24_v3, %v22_v1  ;;  %p87_p8 = scmp.ne.s32.totalorder %s50_s18, %s86_s19  ;;  %p92_p10 = scmp.lt.s32.totalorder %s86_s19, %s86_s19 }
  0x17   :  { %v27_v6 = vmul.f32 0.044715, %v25_v4  ;;  %v28_v7 = vmul.f32 0.044715, %v26_v5  ;;  %p93_p11 = por %p92_p10, %p91_p9 }
  0x19   :  { %v29_v8 = vadd.f32 %v27_v6, %v21_v0  ;;  %v30_v9 = vadd.f32 %v28_v7, %v22_v1  ;;  %p94_p12 = pnand %p93_p11, %p87_p8 }
  0x1b   :  { %v31_v10 = vmul.f32 0.7978846, %v29_v8  ;;  %v32_v11 = vmul.f32 0.7978846, %v30_v9 }
  0x1d   :  { %60 = vtanh.f32 %v31_v10 }
  0x1e   :  { %62 = vtanh.f32 %v32_v11 }
  0x27   :  { %v61_v12 = vpop.eup %60 }
  0x28   :  { %v63_v13 = vpop.eup %62  ;;  %v35_v14 = vadd.f32 1.0, %v61_v12 }
  0x29   :  { %v36_v15 = vadd.f32 1.0, %v63_v13 }
  0x2a   :  { %v37_v16 = vmul.f32 0.5, %v35_v14 }
  0x2b   :  { %v38_v17 = vmul.f32 0.5, %v36_v15 }
  0x2c   :  { %v39_v18 = vmul.f32 %v37_v16, %v21_v0 }
  0x2d   :  { %v40_v19 = vmul.f32 %v38_v17, %v22_v1 }
  0x2e   :  { %41 = vst [vmem:[#allocation5] sm:$0xff] %v39_v18 }
  0x2f   :  { %42 = vst [vmem:[#allocation5 + $0x8] sm:$0xff] %v40_v19 }
  0x30   :  { %97 = shalt.err (!%p94_p12)
}
  0x31   :  { %s98_s22 = scalar_lea.hbm %s149_s1, 256 }
  0x32   :  { %p99_p13 = scmp.ne.s32.totalorder %s149_s1, %s98_s22  ;;  %p102_p0 = scmp.lt.u32.totalorder %s98_s22, %s149_s1 }
  0x34   :  { %p104_p1 = pnand %p102_p0, %p99_p13 }
  0x36   :  { %107 = shalt.err (!%p104_p1)
}
  0x37   :  { %52 = dma.vmem_to_hbm [thread:$0]  %s50_s18, 256, %s149_s1, [#allocation4]  }
  0x38   :  { %110 = dma.done.wait [#allocation4], 256  }
  0x39   :  { %111 = vsyncadd [#allocation4], 4294967040 }
  0x3a   :  { %56 = vsyncpa [#allocation3], 1 }
  0x3b   :  { %57 = vsyncpa [#allocation4], 1 }

</bundles_post_ra>
